<compile_context>
chip_gen: v6e
topology: v6e:2x2x1
jax: 0.10.0
libtpu: 0.0.40
codegen_flags: <defaults>
</compile_context>

<pallas_src>
import jax
import jax.numpy as jnp
from jax.experimental import pallas as pl
from jax.experimental.pallas import tpu as pltpu


def _round_up(x, m):
    return (x + m - 1) // m * m


# ---------------------------------------------------------------------------
# Fused 5-layer MLP kernel (feature-major / batch-on-lanes inside the kernel)
# ---------------------------------------------------------------------------
def _nrm_kernel(e1_ref, e2_ref,
                w1, b1, w2, b2,          # projection: 144->64, 64->32
                w3, b3, w4, b4, w5, b5,  # regression: 32->16, 16->8, 8->1
                out_ref):
    bt = e1_ref.shape[0]                 # static batch tile

    # Stack the two siamese inputs along the batch (sublane) axis so the two
    # projection layers are issued as one long matmul: (2*bt, 144).
    x = jnp.concatenate([e1_ref[...], e2_ref[...]], axis=0)

    # Layer 1: contract feature dims of W1 (64,144) and x (2bt,144) -> (64,2bt)
    # (batch on lanes => lane-dense activations from here on).
    h = jax.lax.dot_general(w1[...], x, (((1,), (1,)), ((), ())),
                            preferred_element_type=jnp.float32)
    h = jnp.maximum(h + b1[...], 0.0)

    # Layer 2: (32,64) @ (64,2bt) -> (32,2bt)
    h = jnp.dot(w2[...], h, preferred_element_type=jnp.float32)
    h = jnp.maximum(h + b2[...], 0.0)

    # Split the stacked tile (lane slice at a multiple of 128) and subtract.
    d = h[:, :bt] - h[:, bt:]

    # Regression head, all feature-major.
    h = jnp.dot(w3[...], d, preferred_element_type=jnp.float32) + b3[...]
    h = jnp.maximum(h, 0.0)
    h = jnp.dot(w4[...], h, preferred_element_type=jnp.float32) + b4[...]
    h = jnp.maximum(h, 0.0)
    # Final layer: (1,8) @ (8,bt) -> (1,bt); output block is lane-dense.
    out_ref[...] = jnp.dot(w5[...], h, preferred_element_type=jnp.float32) + b5[...]


def neural_regression_forward(e1, e2, params, *, batch_tile=512):
    """Fused forward pass. e1, e2: (B, 144) float32. Returns (B,) like
    PyTorch's .squeeze() of the (B, 1) result."""
    B, D_in = e1.shape
    assert e2.shape == (B, D_in)

    (w1, b1), (w2, b2), (w3, b3), (w4, b4), (w5, b5) = params

    # Batch tile: multiple of 128 (lane-dense), no larger than needed.
    bt = min(batch_tile, _round_up(B, 128))
    bt = max(128, (bt // 128) * 128)
    B_pad = _round_up(B, bt)
    if B_pad != B:
        pad = B_pad - B
        e1 = jnp.pad(e1, ((0, pad), (0, 0)))
        e2 = jnp.pad(e2, ((0, pad), (0, 0)))

    grid = (B_pad // bt,)

    def batch_spec():
        return pl.BlockSpec((bt, D_in), lambda i: (i, 0))

    def full_spec(shape):
        return pl.BlockSpec(shape, lambda i: (0, 0))

    in_specs = [
        batch_spec(),            # e1 tile (bt, 144)
        batch_spec(),            # e2 tile (bt, 144)
        full_spec(w1.shape), full_spec(b1.shape),
        full_spec(w2.shape), full_spec(b2.shape),
        full_spec(w3.shape), full_spec(b3.shape),
        full_spec(w4.shape), full_spec(b4.shape),
        full_spec(w5.shape), full_spec(b5.shape),
    ]
    # Lane-dense output slab: (1, B_pad) with (1, bt) blocks.
    out_spec = pl.BlockSpec((1, bt), lambda i: (0, i))

    out = pl.pallas_call(
        _nrm_kernel,
        out_shape=jax.ShapeDtypeStruct((1, B_pad), jnp.float32),
        grid=grid,
        in_specs=in_specs,
        out_specs=out_spec,
        compiler_params=pltpu.CompilerParams(
            dimension_semantics=("parallel",)),
    )(e1, e2, w1, b1, w2, b2, w3, b3, w4, b4, w5, b5)

    return out[0, :B]  # drop padding; == .squeeze() of a (B, 1) result


# ---------------------------------------------------------------------------
# Deterministic parameter init mimicking nn.Linear default:
# U(-1/sqrt(fan_in), 1/sqrt(fan_in)). Weights kept PyTorch-style (out, in),
# biases (out, 1) for feature-major broadcast over the lane (batch) axis.
# ---------------------------------------------------------------------------
def init_params(key):
    dims = [(144, 64), (64, 32), (32, 16), (16, 8), (8, 1)]
    params = []
    for (fan_in, fan_out) in dims:
        key, kw, kb = jax.random.split(key, 3)
        bound = 1.0 / jnp.sqrt(fan_in)
        w = jax.random.uniform(kw, (fan_out, fan_in), jnp.float32,
                               minval=-bound, maxval=bound)
        b = jax.random.uniform(kb, (fan_out, 1), jnp.float32,
                               minval=-bound, maxval=bound)
        params.append((w, b))
    return params


# Pure-JAX reference (matches PyTorch semantics: x @ W.T + b).
def _ref_forward(e1, e2, params):
    def lin(x, w, b):
        return x @ w.T + b[:, 0]

    def proj(x):
        h = jnp.maximum(lin(x, *params[0]), 0.0)
        return jnp.maximum(lin(h, *params[1]), 0.0)

    d = proj(e1) - proj(e2)
    h = jnp.maximum(lin(d, *params[2]), 0.0)
    h = jnp.maximum(lin(h, *params[3]), 0.0)
    return lin(h, *params[4]).reshape(-1)


if __name__ == "__main__":
    key = jax.random.PRNGKey(0)
    kp, k1, k2, k3, k4 = jax.random.split(key, 5)

    params = init_params(kp)

    # Small demo batch (padded internally to one 128-wide lane tile).
    B = 16
    e1 = jax.random.normal(k1, (B, 144), jnp.float32)
    e2 = jax.random.normal(k2, (B, 144), jnp.float32)

    out = neural_regression_forward(e1, e2, params)
    out = jax.block_until_ready(out)
    ref = _ref_forward(e1, e2, params)
    assert out.shape == (B,)
    assert jnp.allclose(out, ref, atol=1e-4, rtol=1e-4), (out, ref)

    # Exercise the multi-tile + padding path (B not a multiple of the tile).
    B2 = 300
    f1 = jax.random.normal(k3, (B2, 144), jnp.float32)
    f2 = jax.random.normal(k4, (B2, 144), jnp.float32)
    out2 = jax.block_until_ready(
        neural_regression_forward(f1, f2, params, batch_tile=128))
    ref2 = _ref_forward(f1, f2, params)
    assert out2.shape == (B2,)
    assert jnp.allclose(out2, ref2, atol=1e-4, rtol=1e-4), (out2, ref2)

    print("KERNEL_OK")
</pallas_src>

<mosaic_0001>
module attributes {stable_mosaic.version = 11 : i64} {
  func.func @_nrm_kernel(%arg0: i32, %arg1: memref<128x144xf32, #tpu.memory_space<vmem>>, %arg2: memref<128x144xf32, #tpu.memory_space<vmem>>, %arg3: memref<64x144xf32, #tpu.memory_space<vmem>>, %arg4: memref<64x1xf32, #tpu.memory_space<vmem>>, %arg5: memref<32x64xf32, #tpu.memory_space<vmem>>, %arg6: memref<32x1xf32, #tpu.memory_space<vmem>>, %arg7: memref<16x32xf32, #tpu.memory_space<vmem>>, %arg8: memref<16x1xf32, #tpu.memory_space<vmem>>, %arg9: memref<8x16xf32, #tpu.memory_space<vmem>>, %arg10: memref<8x1xf32, #tpu.memory_space<vmem>>, %arg11: memref<1x8xf32, #tpu.memory_space<vmem>>, %arg12: memref<1x1xf32, #tpu.memory_space<vmem>>, %arg13: memref<1x128xf32, #tpu.memory_space<vmem>>) attributes {dimension_semantics = [#tpu.dimension_semantics<parallel>], iteration_bounds = array<i64: 1>, scalar_prefetch = 0 : i64, scratch_operands = 0 : i64, tpu.core_type = #tpu.core_type<tc>, window_params = [{transform_indices = @transform_0, window_bounds = array<i64: 128, 144>}, {transform_indices = @transform_1, window_bounds = array<i64: 128, 144>}, {pipeline_mode = #tpu.pipeline_mode<synchronous>, transform_indices = @transform_2, window_bounds = array<i64: 64, 144>}, {pipeline_mode = #tpu.pipeline_mode<synchronous>, transform_indices = @transform_3, window_bounds = array<i64: 64, 1>}, {pipeline_mode = #tpu.pipeline_mode<synchronous>, transform_indices = @transform_4, window_bounds = array<i64: 32, 64>}, {pipeline_mode = #tpu.pipeline_mode<synchronous>, transform_indices = @transform_5, window_bounds = array<i64: 32, 1>}, {pipeline_mode = #tpu.pipeline_mode<synchronous>, transform_indices = @transform_6, window_bounds = array<i64: 16, 32>}, {pipeline_mode = #tpu.pipeline_mode<synchronous>, transform_indices = @transform_7, window_bounds = array<i64: 16, 1>}, {pipeline_mode = #tpu.pipeline_mode<synchronous>, transform_indices = @transform_8, window_bounds = array<i64: 8, 16>}, {pipeline_mode = #tpu.pipeline_mode<synchronous>, transform_indices = @transform_9, window_bounds = array<i64: 8, 1>}, {pipeline_mode = #tpu.pipeline_mode<synchronous>, transform_indices = @transform_10, window_bounds = array<i64: 1, 8>}, {pipeline_mode = #tpu.pipeline_mode<synchronous>, transform_indices = @transform_11, window_bounds = array<i64: 1, 1>}, {transform_indices = @transform_12, window_bounds = array<i64: 1, 128>}]} {
    %c0 = arith.constant 0 : index
    %c0_0 = arith.constant 0 : index
    %0 = vector.load %arg1[%c0, %c0_0] : memref<128x144xf32, #tpu.memory_space<vmem>>, vector<128x144xf32>
    %c0_1 = arith.constant 0 : index
    %c0_2 = arith.constant 0 : index
    %1 = vector.load %arg2[%c0_1, %c0_2] : memref<128x144xf32, #tpu.memory_space<vmem>>, vector<128x144xf32>
    %2 = tpu.concatenate %0, %1 in 0 : vector<128x144xf32>, vector<128x144xf32> -> vector<256x144xf32>
    %c0_3 = arith.constant 0 : index
    %c0_4 = arith.constant 0 : index
    %3 = vector.load %arg3[%c0_3, %c0_4] : memref<64x144xf32, #tpu.memory_space<vmem>>, vector<64x144xf32>
    %cst = arith.constant dense<0.000000e+00> : vector<64x256xf32>
    %4 = tpu.matmul %3, %2, %cst {dimension_numbers = #tpu.dot_dimension_numbers<[1], [1], [0], [0], [0, 0, 1, 0], [], []>} : vector<64x144xf32>, vector<256x144xf32>, vector<64x256xf32> -> vector<64x256xf32>
    %c0_5 = arith.constant 0 : index
    %c0_6 = arith.constant 0 : index
    %5 = vector.load %arg4[%c0_5, %c0_6] : memref<64x1xf32, #tpu.memory_space<vmem>>, vector<64x1xf32>
    %6 = vector.broadcast %5 : vector<64x1xf32> to vector<64x256xf32>
    %7 = arith.addf %4, %6 : vector<64x256xf32>
    %cst_7 = arith.constant 0.000000e+00 : f32
    %8 = vector.broadcast %cst_7 : f32 to vector<64x256xf32>
    %9 = arith.maximumf %7, %8 : vector<64x256xf32>
    %c0_8 = arith.constant 0 : index
    %c0_9 = arith.constant 0 : index
    %10 = vector.load %arg5[%c0_8, %c0_9] : memref<32x64xf32, #tpu.memory_space<vmem>>, vector<32x64xf32>
    %cst_10 = arith.constant dense<0.000000e+00> : vector<32x256xf32>
    %11 = tpu.matmul %10, %9, %cst_10 {dimension_numbers = #tpu.dot_dimension_numbers<[1], [0], [0], [1], [0, 0, 1, 1], [], []>} : vector<32x64xf32>, vector<64x256xf32>, vector<32x256xf32> -> vector<32x256xf32>
    %c0_11 = arith.constant 0 : index
    %c0_12 = arith.constant 0 : index
    %12 = vector.load %arg6[%c0_11, %c0_12] : memref<32x1xf32, #tpu.memory_space<vmem>>, vector<32x1xf32>
    %13 = vector.broadcast %12 : vector<32x1xf32> to vector<32x256xf32>
    %14 = arith.addf %11, %13 : vector<32x256xf32>
    %cst_13 = arith.constant 0.000000e+00 : f32
    %15 = vector.broadcast %cst_13 : f32 to vector<32x256xf32>
    %16 = arith.maximumf %14, %15 : vector<32x256xf32>
    %17 = vector.extract_strided_slice %16 {offsets = [0, 0], sizes = [32, 128], strides = [1, 1]} : vector<32x256xf32> to vector<32x128xf32>
    %18 = vector.extract_strided_slice %16 {offsets = [0, 128], sizes = [32, 128], strides = [1, 1]} : vector<32x256xf32> to vector<32x128xf32>
    %19 = arith.subf %17, %18 : vector<32x128xf32>
    %c0_14 = arith.constant 0 : index
    %c0_15 = arith.constant 0 : index
    %20 = vector.load %arg7[%c0_14, %c0_15] : memref<16x32xf32, #tpu.memory_space<vmem>>, vector<16x32xf32>
    %cst_16 = arith.constant dense<0.000000e+00> : vector<16x128xf32>
    %21 = tpu.matmul %20, %19, %cst_16 {dimension_numbers = #tpu.dot_dimension_numbers<[1], [0], [0], [1], [0, 0, 1, 1], [], []>} : vector<16x32xf32>, vector<32x128xf32>, vector<16x128xf32> -> vector<16x128xf32>
    %c0_17 = arith.constant 0 : index
    %c0_18 = arith.constant 0 : index
    %22 = vector.load %arg8[%c0_17, %c0_18] : memref<16x1xf32, #tpu.memory_space<vmem>>, vector<16x1xf32>
    %23 = vector.broadcast %22 : vector<16x1xf32> to vector<16x128xf32>
    %24 = arith.addf %21, %23 : vector<16x128xf32>
    %cst_19 = arith.constant 0.000000e+00 : f32
    %25 = vector.broadcast %cst_19 : f32 to vector<16x128xf32>
    %26 = arith.maximumf %24, %25 : vector<16x128xf32>
    %c0_20 = arith.constant 0 : index
    %c0_21 = arith.constant 0 : index
    %27 = vector.load %arg9[%c0_20, %c0_21] : memref<8x16xf32, #tpu.memory_space<vmem>>, vector<8x16xf32>
    %cst_22 = arith.constant dense<0.000000e+00> : vector<8x128xf32>
    %28 = tpu.matmul %27, %26, %cst_22 {dimension_numbers = #tpu.dot_dimension_numbers<[1], [0], [0], [1], [0, 0, 1, 1], [], []>} : vector<8x16xf32>, vector<16x128xf32>, vector<8x128xf32> -> vector<8x128xf32>
    %c0_23 = arith.constant 0 : index
    %c0_24 = arith.constant 0 : index
    %29 = vector.load %arg10[%c0_23, %c0_24] : memref<8x1xf32, #tpu.memory_space<vmem>>, vector<8x1xf32>
    %30 = vector.broadcast %29 : vector<8x1xf32> to vector<8x128xf32>
    %31 = arith.addf %28, %30 : vector<8x128xf32>
    %cst_25 = arith.constant 0.000000e+00 : f32
    %32 = vector.broadcast %cst_25 : f32 to vector<8x128xf32>
    %33 = arith.maximumf %31, %32 : vector<8x128xf32>
    %c0_26 = arith.constant 0 : index
    %c0_27 = arith.constant 0 : index
    %34 = vector.load %arg11[%c0_26, %c0_27] : memref<1x8xf32, #tpu.memory_space<vmem>>, vector<1x8xf32>
    %cst_28 = arith.constant dense<0.000000e+00> : vector<1x128xf32>
    %35 = tpu.matmul %34, %33, %cst_28 {dimension_numbers = #tpu.dot_dimension_numbers<[1], [0], [0], [1], [0, 0, 1, 1], [], []>} : vector<1x8xf32>, vector<8x128xf32>, vector<1x128xf32> -> vector<1x128xf32>
    %c0_29 = arith.constant 0 : index
    %c0_30 = arith.constant 0 : index
    %36 = vector.load %arg12[%c0_29, %c0_30] : memref<1x1xf32, #tpu.memory_space<vmem>>, vector<1x1xf32>
    %37 = vector.broadcast %36 : vector<1x1xf32> to vector<1x128xf32>
    %38 = arith.addf %35, %37 : vector<1x128xf32>
    %c0_31 = arith.constant 0 : index
    %c0_32 = arith.constant 0 : index
    %39 = vector.load %arg13[%c0_31, %c0_32] : memref<1x128xf32, #tpu.memory_space<vmem>>, vector<1x128xf32>
    tpu.vector_store %arg13[%c0_31, %c0_32], %38 {strides = array<i32>} : memref<1x128xf32, #tpu.memory_space<vmem>>, vector<1x128xf32>,
    return
  }
  func.func @transform_0(%arg0: i32) -> (i32, i32) {
    %c0_i32 = arith.constant 0 : i32
    %c0_i32_0 = arith.constant 0 : i32
    return %arg0, %c0_i32 : i32, i32
  }
  func.func @transform_1(%arg0: i32) -> (i32, i32) {
    %c0_i32 = arith.constant 0 : i32
    %c0_i32_0 = arith.constant 0 : i32
    return %arg0, %c0_i32 : i32, i32
  }
  func.func @transform_2(%arg0: i32) -> (i32, i32) {
    %c0_i32 = arith.constant 0 : i32
    %c0_i32_0 = arith.constant 0 : i32
    %c0_i32_1 = arith.constant 0 : i32
    return %c0_i32, %c0_i32_0 : i32, i32
  }
  func.func @transform_3(%arg0: i32) -> (i32, i32) {
    %c0_i32 = arith.constant 0 : i32
    %c0_i32_0 = arith.constant 0 : i32
    %c0_i32_1 = arith.constant 0 : i32
    return %c0_i32, %c0_i32_0 : i32, i32
  }
  func.func @transform_4(%arg0: i32) -> (i32, i32) {
    %c0_i32 = arith.constant 0 : i32
    %c0_i32_0 = arith.constant 0 : i32
    %c0_i32_1 = arith.constant 0 : i32
    return %c0_i32, %c0_i32_0 : i32, i32
  }
  func.func @transform_5(%arg0: i32) -> (i32, i32) {
    %c0_i32 = arith.constant 0 : i32
    %c0_i32_0 = arith.constant 0 : i32
    %c0_i32_1 = arith.constant 0 : i32
    return %c0_i32, %c0_i32_0 : i32, i32
  }
  func.func @transform_6(%arg0: i32) -> (i32, i32) {
    %c0_i32 = arith.constant 0 : i32
    %c0_i32_0 = arith.constant 0 : i32
    %c0_i32_1 = arith.constant 0 : i32
    return %c0_i32, %c0_i32_0 : i32, i32
  }
  func.func @transform_7(%arg0: i32) -> (i32, i32) {
    %c0_i32 = arith.constant 0 : i32
    %c0_i32_0 = arith.constant 0 : i32
    %c0_i32_1 = arith.constant 0 : i32
    return %c0_i32, %c0_i32_0 : i32, i32
  }
  func.func @transform_8(%arg0: i32) -> (i32, i32) {
    %c0_i32 = arith.constant 0 : i32
    %c0_i32_0 = arith.constant 0 : i32
    %c0_i32_1 = arith.constant 0 : i32
    return %c0_i32, %c0_i32_0 : i32, i32
  }
  func.func @transform_9(%arg0: i32) -> (i32, i32) {
    %c0_i32 = arith.constant 0 : i32
    %c0_i32_0 = arith.constant 0 : i32
    %c0_i32_1 = arith.constant 0 : i32
    return %c0_i32, %c0_i32_0 : i32, i32
  }
  func.func @transform_10(%arg0: i32) -> (i32, i32) {
    %c0_i32 = arith.constant 0 : i32
    %c0_i32_0 = arith.constant 0 : i32
    %c0_i32_1 = arith.constant 0 : i32
    return %c0_i32, %c0_i32_0 : i32, i32
  }
  func.func @transform_11(%arg0: i32) -> (i32, i32) {
    %c0_i32 = arith.constant 0 : i32
    %c0_i32_0 = arith.constant 0 : i32
    %c0_i32_1 = arith.constant 0 : i32
    return %c0_i32, %c0_i32_0 : i32, i32
  }
  func.func @transform_12(%arg0: i32) -> (i32, i32) {
    %c0_i32 = arith.constant 0 : i32
    %c0_i32_0 = arith.constant 0 : i32
    return %c0_i32, %arg0 : i32, i32
  }
}

</mosaic_0001>

<bundles_post_ra>
// kernel: tpu_custom_call.1
= control target key start
LH: loop header
LB: loop body
LE: loop exit
PB: predicated region body
PF: predicated region fallthrough
CT: control target
= control target key end

     0   :  { %s1391_s0 = inlined_call_operand.vmem [shape: f32[128,144], index: 0, kind: input, shape index: {}]   ;;  %s1392_s1 = inlined_call_operand.vmem [shape: f32[128,144], index: 1, kind: input, shape index: {}]   ;;  %s1393_s2 = inlined_call_operand.vmem [shape: f32[64,144], index: 2, kind: input, shape index: {}]   ;;  %s1394_s3 = inlined_call_operand.vmem [shape: f32[64,1], index: 3, kind: input, shape index: {}]   ;;  %s1395_s4 = inlined_call_operand.vmem [shape: f32[32,64], index: 4, kind: input, shape index: {}]   ;;  %s1396_s5 = inlined_call_operand.vmem [shape: f32[32,1], index: 5, kind: input, shape index: {}]   ;;  %s1397_s6 = inlined_call_operand.vmem [shape: f32[16,32], index: 6, kind: input, shape index: {}]   ;;  %s1398_s7 = inlined_call_operand.vmem [shape: f32[16,1], index: 7, kind: input, shape index: {}]   ;;  %s1399_s8 = inlined_call_operand.vmem [shape: f32[8,16], index: 8, kind: input, shape index: {}]   ;;  %s1400_s9 = inlined_call_operand.vmem [shape: f32[8,1], index: 9, kind: input, shape index: {}]   ;;  %s1401_s10 = inlined_call_operand.vmem [shape: f32[1,8], index: 10, kind: input, shape index: {}]   ;;  %s1402_s11 = inlined_call_operand.<no memory space> [shape: f32[1,1], index: 11, kind: input, shape index: {}]   ;;  %s1403_s12 = inlined_call_operand.hbm [shape: f32[1,128], index: 12, kind: output, shape index: {}]  }
   0x1   :  { %v17_v0 = vstv %s1402_s11 }
   0x2   :  { %18 = vst [vmem:[#allocation2] sm:$0x1] %v17_v0 }
   0x3   :  { %v75_v1 = vld [vmem:[%s1391_s0 + $0xf8] sm:$0xff]  ;;  %vm172_vm0 = vcmask 130048   ;;  %v74_v2 = vld [vmem:[%s1391_s0 + $0xf0] sm:$0xff]  ;;  %v73_v3 = vld [vmem:[%s1391_s0 + $0xe8] sm:$0xff] }
   0x4   :  { %843 = vmatprep.subr.msk.mxu0 %vm172_vm0, %v75_v1  ;;  %v72_v4 = vld [vmem:[%s1391_s0 + $0xe0] sm:$0xff]  ;;  %v71_v5 = vld [vmem:[%s1391_s0 + $0xd8] sm:$0xff]  ;;  %v70_v6 = vld [vmem:[%s1391_s0 + $0xd0] sm:$0xff] }
   0x5   :  { %294 = vmatpush1.xpose.msra.mxu0 %v74_v2  ;;  %v69_v7 = vld [vmem:[%s1391_s0 + $0xc8] sm:$0xff]  ;;  %v68_v8 = vld [vmem:[%s1391_s0 + $0xc0] sm:$0xff]  ;;  %v67_v9 = vld [vmem:[%s1391_s0 + $0xb8] sm:$0xff] }
   0x6   :  { %844 = vmatprep.subr.msk.mxu0 %vm172_vm0, %v73_v3  ;;  %v66_v10 = vld [vmem:[%s1391_s0 + $0xb0] sm:$0xff]  ;;  %v65_v11 = vld [vmem:[%s1391_s0 + $0xa8] sm:$0xff]  ;;  %v64_v12 = vld [vmem:[%s1391_s0 + $0xa0] sm:$0xff] }
   0x7   :  { %v63_v13 = vld [vmem:[%s1391_s0 + $0x98] sm:$0xff]  ;;  %v109_v14 = vld [vmem:[%s1393_s2 + $0x8] sm:$0xff]  ;;  %v62_v15 = vld [vmem:[%s1391_s0 + $0x90] sm:$0xff] }
   0x8   :  { %875 = vmatprep.mubr.msk.f32.mxu0 %vm172_vm0, %v109_v14  ;;  %v61_v16 = vld [vmem:[%s1391_s0 + $0x88] sm:$0xff] }
   0x9   :  { %296 = vmatpush1.xpose.msra.mxu0 %v72_v4 }
   0xa   :  { %845 = vmatprep.subr.msk.mxu0 %vm172_vm0, %v71_v5 }
   0xd   :  { %298 = vmatpush1.xpose.msra.mxu0 %v70_v6 }
   0xe   :  { %846 = vmatprep.subr.msk.mxu0 %vm172_vm0, %v69_v7 }
  0x11   :  { %300 = vmatpush1.xpose.msra.mxu0 %v68_v8 }
  0x12   :  { %847 = vmatprep.subr.msk.mxu0 %vm172_vm0, %v67_v9 }
  0x15   :  { %302 = vmatpush1.xpose.msra.mxu0 %v66_v10 }
  0x16   :  { %848 = vmatprep.subr.msk.mxu0 %vm172_vm0, %v65_v11 }
  0x19   :  { %304 = vmatpush1.xpose.msra.mxu0 %v64_v12 }
  0x1a   :  { %849 = vmatprep.subr.msk.mxu0 %vm172_vm0, %v63_v13 }
  0x1d   :  { %306 = vmatpush1.xpose.msra.mxu0 %v62_v15 }
  0x1e   :  { %19 = vsyncpa [#allocation4], 0  ;;  %850 = vmatprep.subr.msk.mxu0 %vm172_vm0, %v61_v16  ;;  %v60_v17 = vld [vmem:[%s1391_s0 + $0x80] sm:$0xff]  ;;  %v59_v18 = vld [vmem:[%s1391_s0 + $0x78] sm:$0xff]  ;;  %v953_v20 = vmov 0   ;;  %vm450_vm1 = vcmask 523264  }
  0x1f   :  { %v129_v19 = vld [vmem:[%s1394_s3 + $0x28] sm:$0xff]  ;;  %930 = vset.pattern.permute.xlu1 %v953_v20  ;;  %v131_v21 = vld [vmem:[%s1394_s3 + $0x38] sm:$0xff]  ;;  %v58_v22 = vld [vmem:[%s1391_s0 + $0x70] sm:$0xff]  ;;  %929 = vset.pattern.permute.xlu0 %v953_v20  ;;  %vm578_vm2 = vcmask 261120   ;;  %vm955_vm3 = vmmov 0   ;;  %vm754_vm4 = vcmask 64512  }
  0x20   :  { %159 = vperm.xlu1 %930, %v129_v19   ;;  %v57_v23 = vld [vmem:[%s1391_s0 + $0x68] sm:$0xff]  ;;  %v128_v24 = vld [vmem:[%s1394_s3 + $0x20] sm:$0xff]  ;;  %169 = vperm.xlu0 %929, %v131_v21   ;;  %v130_v25 = vld [vmem:[%s1394_s3 + $0x30] sm:$0xff] }
  0x21   :  { %308 = vmatpush1.xpose.msra.mxu0 %v60_v17  ;;  %v56_v26 = vld [vmem:[%s1391_s0 + $0x60] sm:$0xff]  ;;  %v55_v27 = vld [vmem:[%s1391_s0 + $0x58] sm:$0xff]  ;;  %v126_v28 = vld [vmem:[%s1394_s3 + $0x10] sm:$0xff] }
  0x22   :  { %851 = vmatprep.subr.msk.mxu0 %vm172_vm0, %v59_v18  ;;  %v127_v29 = vld [vmem:[%s1394_s3 + $0x18] sm:$0xff]  ;;  %v54_v30 = vld [vmem:[%s1391_s0 + $0x50] sm:$0xff]  ;;  %v53_v31 = vld [vmem:[%s1391_s0 + $0x48] sm:$0xff] }
  0x23   :  { %v124_v32 = vld [vmem:[%s1394_s3] sm:$0xff]  ;;  %v125_v33 = vld [vmem:[%s1394_s3 + $0x8] sm:$0xff]  ;;  %v51_v35 = vld [vmem:[%s1391_s0 + $0x38] sm:$0xff] }
  0x24   :  { %154 = vperm.xlu1 %930, %v128_v24   ;;  %164 = vperm.xlu0 %929, %v130_v25   ;;  %v52_v34 = vld [vmem:[%s1391_s0 + $0x40] sm:$0xff]  ;;  %v428_v36 = vld [vmem:[%s1396_s5 + $0x10] sm:$0xff]  ;;  %v429_v37 = vld [vmem:[%s1396_s5 + $0x18] sm:$0xff] }
  0x25   :  { %310 = vmatpush1.xpose.msra.mxu0 %v58_v22  ;;  %v50_v38 = vld [vmem:[%s1391_s0 + $0x30] sm:$0xff]  ;;  %v49_v39 = vld [vmem:[%s1391_s0 + $0x28] sm:$0xff]  ;;  %v426_v40 = vld [vmem:[%s1396_s5] sm:$0xff] }
  0x26   :  { %852 = vmatprep.subr.msk.mxu0 %vm172_vm0, %v57_v23  ;;  %v427_v41 = vld [vmem:[%s1396_s5 + $0x8] sm:$0xff]  ;;  %v48_v42 = vld [vmem:[%s1391_s0 + $0x20] sm:$0xff]  ;;  %v47_v43 = vld [vmem:[%s1391_s0 + $0x18] sm:$0xff] }
  0x27   :  { %v566_v44 = vld [vmem:[%s1398_s7] sm:$0xff]  ;;  %v567_v45 = vld [vmem:[%s1398_s7 + $0x8] sm:$0xff]  ;;  %v46_v46 = vld [vmem:[%s1391_s0 + $0x10] sm:$0xff] }
  0x28   :  { %144 = vperm.xlu1 %930, %v126_v28   ;;  %149 = vperm.xlu0 %929, %v127_v29   ;;  %v45_v47 = vld [vmem:[%s1391_s0 + $0x8] sm:$0xff]  ;;  %v744_v48 = vld [vmem:[#allocation2] sm:$0x1]  ;;  %v107_v51 = vld [vmem:[%s1392_s1 + $0xf8] sm:$0xff] }
  0x29   :  { %312 = vmatpush1.xpose.msra.mxu0 %v56_v26  ;;  %v663_v49 = vld [vmem:[%s1400_s9] sm:$0xff]  ;;  %v106_v52 = vld [vmem:[%s1392_s1 + $0xf0] sm:$0xff]  ;;  %v105_v53 = vld [vmem:[%s1392_s1 + $0xe8] sm:$0xff] }
  0x2a   :  { %853 = vmatprep.subr.msk.mxu0 %vm172_vm0, %v55_v27  ;;  %v44_v50 = vld [vmem:[%s1391_s0] sm:$0xff]  ;;  %v103_v55 = vld [vmem:[%s1392_s1 + $0xd8] sm:$0xff]  ;;  %v102_v56 = vld [vmem:[%s1392_s1 + $0xd0] sm:$0xff] }
  0x2b   :  { %v104_v54 = vld [vmem:[%s1392_s1 + $0xe0] sm:$0xff]  ;;  %v101_v57 = vld [vmem:[%s1392_s1 + $0xc8] sm:$0xff]  ;;  %v99_v59 = vld [vmem:[%s1392_s1 + $0xb8] sm:$0xff] }
  0x2c   :  { %134 = vperm.xlu1 %930, %v124_v32   ;;  %139 = vperm.xlu0 %929, %v125_v33   ;;  %v100_v58 = vld [vmem:[%s1392_s1 + $0xc0] sm:$0xff]  ;;  %v98_v60 = vld [vmem:[%s1392_s1 + $0xb0] sm:$0xff]  ;;  %v97_v61 = vld [vmem:[%s1392_s1 + $0xa8] sm:$0xff] }
  0x2d   :  { %314 = vmatpush1.xpose.msra.mxu0 %v54_v30  ;;  %v96_v62 = vld [vmem:[%s1392_s1 + $0xa0] sm:$0xff]  ;;  %v95_v63 = vld [vmem:[%s1392_s1 + $0x98] sm:$0xff]  ;;  %v94_v0 = vld [vmem:[%s1392_s1 + $0x90] sm:$0xff] }
  0x2e   :  { %854 = vmatprep.subr.msk.mxu0 %vm172_vm0, %v53_v31  ;;  %v93_v1 = vld [vmem:[%s1392_s1 + $0x88] sm:$0xff]  ;;  %v92_v2 = vld [vmem:[%s1392_s1 + $0x80] sm:$0xff]  ;;  %v91_v3 = vld [vmem:[%s1392_s1 + $0x78] sm:$0xff] }
  0x2f   :  { %v90_v4 = vld [vmem:[%s1392_s1 + $0x70] sm:$0xff]  ;;  %v89_v5 = vld [vmem:[%s1392_s1 + $0x68] sm:$0xff]  ;;  %v88_v6 = vld [vmem:[%s1392_s1 + $0x60] sm:$0xff] }
  0x30   :  { %442 = vperm.xlu1 %930, %v428_v36   ;;  %447 = vperm.xlu0 %929, %v429_v37   ;;  %v87_v7 = vld [vmem:[%s1392_s1 + $0x58] sm:$0xff]  ;;  %v86_v8 = vld [vmem:[%s1392_s1 + $0x50] sm:$0xff]  ;;  %v85_v9 = vld [vmem:[%s1392_s1 + $0x48] sm:$0xff] }
  0x31   :  { %316 = vmatpush1.xpose.msra.mxu0 %v52_v34  ;;  %v84_v10 = vld [vmem:[%s1392_s1 + $0x40] sm:$0xff]  ;;  %v83_v11 = vld [vmem:[%s1392_s1 + $0x38] sm:$0xff]  ;;  %v82_v12 = vld [vmem:[%s1392_s1 + $0x30] sm:$0xff]  ;;  %v954_v34 = vmov 0.0  }
  0x32   :  { %855 = vmatprep.subr.msk.mxu0 %vm172_vm0, %v51_v35  ;;  %v81_v13 = vld [vmem:[%s1392_s1 + $0x28] sm:$0xff]  ;;  %v80_v14 = vld [vmem:[%s1392_s1 + $0x20] sm:$0xff]  ;;  %v79_v15 = vld [vmem:[%s1392_s1 + $0x18] sm:$0xff]  ;;  %527 = vmatprep.mubr.f32.mxu1 %v954_v34 }
  0x33   :  { %v78_v16 = vld [vmem:[%s1392_s1 + $0x10] sm:$0xff]  ;;  %v77_v17 = vld [vmem:[%s1392_s1 + $0x8] sm:$0xff]  ;;  %v76_v18 = vld [vmem:[%s1392_s1] sm:$0xff] }
  0x34   :  { %432 = vperm.xlu1 %930, %v426_v40   ;;  %437 = vperm.xlu0 %929, %v427_v41   ;;  %v108_v19 = vld [vmem:[%s1393_s2] sm:$0xff]  ;;  %v111_v20 = vld [vmem:[%s1393_s2 + $0x18] sm:$0xff]  ;;  %v110_v21 = vld [vmem:[%s1393_s2 + $0x10] sm:$0xff] }
  0x35   :  { %318 = vmatpush1.xpose.msra.mxu0 %v50_v38  ;;  %v113_v22 = vld [vmem:[%s1393_s2 + $0x28] sm:$0xff]  ;;  %v112_v23 = vld [vmem:[%s1393_s2 + $0x20] sm:$0xff]  ;;  %v115_v24 = vld [vmem:[%s1393_s2 + $0x38] sm:$0xff] }
  0x36   :  { %856 = vmatprep.subr.msk.mxu0 %vm172_vm0, %v49_v39  ;;  %v114_v25 = vld [vmem:[%s1393_s2 + $0x30] sm:$0xff]  ;;  %v117_v26 = vld [vmem:[%s1393_s2 + $0x48] sm:$0xff]  ;;  %v116_v27 = vld [vmem:[%s1393_s2 + $0x40] sm:$0xff] }
  0x37   :  { %v119_v28 = vld [vmem:[%s1393_s2 + $0x58] sm:$0xff]  ;;  %v118_v29 = vld [vmem:[%s1393_s2 + $0x50] sm:$0xff]  ;;  %v121_v30 = vld [vmem:[%s1393_s2 + $0x68] sm:$0xff] }
  0x38   :  { %570 = vperm.xlu1 %930, %v566_v44   ;;  %575 = vperm.xlu0 %929, %v567_v45   ;;  %v120_v31 = vld [vmem:[%s1393_s2 + $0x60] sm:$0xff]  ;;  %v123_v32 = vld [vmem:[%s1393_s2 + $0x78] sm:$0xff]  ;;  %v122_v33 = vld [vmem:[%s1393_s2 + $0x70] sm:$0xff] }
  0x39   :  { %320 = vmatpush1.xpose.msra.mxu0 %v48_v42 }
  0x3a   :  { %857 = vmatprep.subr.msk.mxu0 %vm172_vm0, %v47_v43 }
  0x3c   :  { %747 = vperm.xlu1 %930, %v744_v48   ;;  %666 = vperm.xlu0 %929, %v663_v49  }
  0x3d   :  { %322 = vmatpush1.xpose.msra.mxu0 %v46_v46 }
  0x3e   :  { %858 = vmatprep.subr.msk.mxu0 %vm172_vm0, %v45_v47 }
  0x41   :  { %324 = vmatpush1.xpose.msra.mxu0 %v44_v50 }
  0x42   :  { %859 = vmatprep.subr.msk.mxu0 %vm172_vm0, %v107_v51 }
  0x45   :  { %326 = vmatpush2.xpose.msra.mxu0 %v106_v52 }
  0x46   :  { %860 = vmatprep.subr.msk.mxu0 %vm172_vm0, %v105_v53 }
  0x49   :  { %328 = vmatpush2.xpose.msra.mxu0 %v104_v54 }
  0x4a   :  { %861 = vmatprep.subr.msk.mxu0 %vm172_vm0, %v103_v55 }
  0x4d   :  { %330 = vmatpush2.xpose.msra.mxu0 %v102_v56 }
  0x4e   :  { %862 = vmatprep.subr.msk.mxu0 %vm172_vm0, %v101_v57 }
  0x51   :  { %332 = vmatpush2.xpose.msra.mxu0 %v100_v58 }
  0x52   :  { %863 = vmatprep.subr.msk.mxu0 %vm172_vm0, %v99_v59 }
  0x55   :  { %334 = vmatpush2.xpose.msra.mxu0 %v98_v60 }
  0x56   :  { %864 = vmatprep.subr.msk.mxu0 %vm172_vm0, %v97_v61 }
  0x59   :  { %336 = vmatpush2.xpose.msra.mxu0 %v96_v62 }
  0x5a   :  { %865 = vmatprep.subr.msk.mxu0 %vm172_vm0, %v95_v63 }
  0x5d   :  { %338 = vmatpush2.xpose.msra.mxu0 %v94_v0 }
  0x5e   :  { %866 = vmatprep.subr.msk.mxu0 %vm172_vm0, %v93_v1 }
  0x61   :  { %340 = vmatpush2.xpose.msra.mxu0 %v92_v2 }
  0x62   :  { %867 = vmatprep.subr.msk.mxu0 %vm172_vm0, %v91_v3 }
  0x65   :  { %342 = vmatpush2.xpose.msra.mxu0 %v90_v4 }
  0x66   :  { %868 = vmatprep.subr.msk.mxu0 %vm172_vm0, %v89_v5 }
  0x69   :  { %344 = vmatpush2.xpose.msra.mxu0 %v88_v6 }
  0x6a   :  { %869 = vmatprep.subr.msk.mxu0 %vm172_vm0, %v87_v7 }
  0x6d   :  { %346 = vmatpush2.xpose.msra.mxu0 %v86_v8 }
  0x6e   :  { %870 = vmatprep.subr.msk.mxu0 %vm172_vm0, %v85_v9 }
  0x71   :  { %348 = vmatpush2.xpose.msra.mxu0 %v84_v10 }
  0x72   :  { %871 = vmatprep.subr.msk.mxu0 %vm172_vm0, %v83_v11 }
  0x75   :  { %350 = vmatpush2.xpose.msra.mxu0 %v82_v12 }
  0x76   :  { %872 = vmatprep.subr.msk.mxu0 %vm172_vm0, %v81_v13 }
  0x79   :  { %352 = vmatpush2.xpose.msra.mxu0 %v80_v14 }
  0x7a   :  { %873 = vmatprep.subr.msk.mxu0 %vm172_vm0, %v79_v15 }
  0x7d   :  { %354 = vmatpush2.xpose.msra.mxu0 %v78_v16 }
  0x7e   :  { %874 = vmatprep.subr.msk.mxu0 %vm172_vm0, %v77_v17 }
  0x81   :  { %356 = vmatpush2.xpose.msra.mxu0 %v76_v18 }
  0x84   :  { %358 = vmatmul.mubr.f32.vlgmr.msra.gmra.mxu0 %v108_v19 }
  0x85   :  { %876 = vmatprep.mubr.msk.f32.mxu0 %vm172_vm0, %v111_v20 }
  0x88   :  { %364 = vmatmul.mubr.f32.gmra.mxu0 %v110_v21 }
  0x89   :  { %877 = vmatprep.mubr.msk.f32.mxu0 %vm172_vm0, %v113_v22 }
  0x8c   :  { %370 = vmatmul.mubr.f32.gmra.mxu0 %v112_v23 }
  0x8d   :  { %878 = vmatprep.mubr.msk.f32.mxu0 %vm172_vm0, %v115_v24 }
  0x90   :  { %376 = vmatmul.mubr.f32.gmra.mxu0 %v114_v25 }
  0x91   :  { %879 = vmatprep.mubr.msk.f32.mxu0 %vm172_vm0, %v117_v26 }
  0x94   :  { %382 = vmatmul.mubr.f32.gmra.mxu0 %v116_v27  ;;  %v422_v27 = vld [vmem:[%s1395_s4] sm:$0xff] }
  0x95   :  { %880 = vmatprep.mubr.msk.f32.mxu0 %vm172_vm0, %v119_v28  ;;  %v423_v28 = vld [vmem:[%s1395_s4 + $0x8] sm:$0xff] }
  0x98   :  { %388 = vmatmul.mubr.f32.gmra.mxu0 %v118_v29  ;;  %v424_v29 = vld [vmem:[%s1395_s4 + $0x10] sm:$0xff] }
  0x99   :  { %881 = vmatprep.mubr.msk.f32.mxu0 %vm172_vm0, %v121_v30  ;;  %v425_v30 = vld [vmem:[%s1395_s4 + $0x18] sm:$0xff] }
  0x9b   :  { %v170_v46 = vpop.permute.xlu0 %169  ;;  %v160_v48 = vpop.permute.xlu1 %159 }
  0x9c   :  { %394 = vmatmul.mubr.f32.gmra.mxu0 %v120_v31  ;;  %v564_v31 = vld [vmem:[%s1397_s6] sm:$0xff] }
  0x9d   :  { %882 = vmatprep.mubr.msk.f32.mxu0 %vm172_vm0, %v123_v32 }
  0x9f   :  { %v165_v51 = vpop.permute.xlu0 %164  ;;  %v155_v53 = vpop.permute.xlu1 %154 }
  0xa0   :  { %400 = vmatmul.mubr.f32.gmra.mxu0 %v122_v33 }
  0xa3   :  { %v150_v59 = vpop.permute.xlu0 %149  ;;  %v145_v0 = vpop.permute.xlu1 %144 }
  0xa7   :  { %v140_v9 = vpop.permute.xlu0 %139  ;;  %v135_v14 = vpop.permute.xlu1 %134 }
 0x144   :  { %v359_v35 = vpop.f32.mrf.mxu0 }
 0x145   :  { %v360_v21 = vadd.f32 %v359_v35, %v135_v14 }
 0x146   :  { %v361_v36 = vpop.f32.mrf.mxu0 }
 0x147   :  { %v362_v19 = vadd.f32 %v361_v36, %v135_v14  ;;  %v406_v26 = vmax.f32 %v360_v21, 0.0 }
 0x148   :  { %v365_v37 = vpop.f32.mrf.mxu0 }
 0x149   :  { %v366_v17 = vadd.f32 %v365_v37, %v140_v9  ;;  %v407_v25 = vmax.f32 %v362_v19, 0.0  ;;  %v448_v37 = vpop.permute.xlu0 %447 }
 0x14a   :  { %v367_v38 = vpop.f32.mrf.mxu0 }
 0x14b   :  { %v368_v15 = vadd.f32 %v367_v38, %v140_v9  ;;  %v408_v24 = vmax.f32 %v366_v17, 0.0  ;;  %v750_v17 = vlaneseq }
 0x14c   :  { %v371_v39 = vpop.f32.mrf.mxu0 }
 0x14d   :  { %v372_v12 = vadd.f32 %v371_v39, %v145_v0  ;;  %v409_v23 = vmax.f32 %v368_v15, 0.0  ;;  %v443_v39 = vpop.permute.xlu1 %442 }
 0x14e   :  { %v373_v40 = vpop.f32.mrf.mxu0 }
 0x14f   :  { %v374_v10 = vadd.f32 %v373_v40, %v145_v0  ;;  %v410_v22 = vmax.f32 %v372_v12, 0.0 }
 0x150   :  { %v377_v41 = vpop.f32.mrf.mxu0 }
 0x151   :  { %v378_v7 = vadd.f32 %v377_v41, %v150_v59  ;;  %v411_v20 = vmax.f32 %v374_v10, 0.0  ;;  %v662_v10 = vld [vmem:[%s1399_s8] sm:$0xff]  ;;  %s956_s8 = smov [#allocation3]  }
 0x152   :  { %v379_v42 = vpop.f32.mrf.mxu0  ;;  %s835_s27 = sshll.u32 %s956_s8, 4  ;;  %s836_s27 = int_to_ptr.vmem [resolvable:$true] %s835_s27 }
 0x153   :  { %v380_v5 = vadd.f32 %v379_v42, %v150_v59  ;;  %v412_v18 = vmax.f32 %v378_v7, 0.0  ;;  %s931_s28 = scalar_lea.vmem %s836_s27, 16  ;;  %s935_s11 = scalar_lea.vmem %s836_s27, 32 }
 0x154   :  { %v383_v43 = vpop.f32.mrf.mxu0  ;;  %p932_p0 = scmp.ne.s32.totalorder %s836_s27, %s931_s28  ;;  %p936_p1 = scmp.lt.s32.totalorder %s836_s27, %s836_s27 }
 0x155   :  { %v384_v3 = vadd.f32 %v383_v43, %v155_v53  ;;  %v413_v16 = vmax.f32 %v380_v5, 0.0  ;;  %p937_p2 = scmp.lt.s32.totalorder %s935_s11, %s931_s28 }
 0x156   :  { %v385_v44 = vpop.f32.mrf.mxu0 }
 0x157   :  { %v386_v1 = vadd.f32 %v385_v44, %v155_v53  ;;  %v414_v13 = vmax.f32 %v384_v3, 0.0  ;;  %v438_v44 = vpop.permute.xlu0 %437  ;;  %p938_p3 = por %p937_p2, %p936_p1 }
 0x158   :  { %v389_v45 = vpop.f32.mrf.mxu0 }
 0x159   :  { %v390_v62 = vadd.f32 %v389_v45, %v160_v48  ;;  %v415_v11 = vmax.f32 %v386_v1, 0.0  ;;  %v565_v1 = vld [vmem:[%s1397_s6 + $0x8] sm:$0xff]  ;;  %p939_p4 = pnand %p938_p3, %p932_p0 }
 0x15a   :  { %v391_v47 = vpop.f32.mrf.mxu0 }
 0x15b   :  { %v392_v60 = vadd.f32 %v391_v47, %v160_v48  ;;  %v416_v8 = vmax.f32 %v390_v62, 0.0 }
 0x15c   :  { %v395_v49 = vpop.f32.mrf.mxu0 }
 0x15d   :  { %v396_v58 = vadd.f32 %v395_v49, %v165_v51  ;;  %v417_v6 = vmax.f32 %v392_v60, 0.0 }
 0x15e   :  { %v397_v50 = vpop.f32.mrf.mxu0 }
 0x15f   :  { %v398_v56 = vadd.f32 %v397_v50, %v165_v51  ;;  %v418_v4 = vmax.f32 %v396_v58, 0.0 }
 0x160   :  { %v401_v52 = vpop.f32.mrf.mxu0 }
 0x161   :  { %v402_v54 = vadd.f32 %v401_v52, %v170_v46  ;;  %v419_v2 = vmax.f32 %v398_v56, 0.0 }
 0x162   :  { %v403_v55 = vpop.f32.mrf.mxu0 }
 0x163   :  { %v404_v57 = vadd.f32 %v403_v55, %v170_v46  ;;  %v420_v63 = vmax.f32 %v402_v54, 0.0  ;;  %v433_v46 = vpop.permute.xlu1 %432 }
 0x165   :  { %v421_v61 = vmax.f32 %v404_v57, 0.0 }
 0x167   :  { %479 = vmatprep.subr.mxu1 %v421_v61  ;;  %v571_v5 = vpop.permute.xlu1 %570 }
 0x168   :  { %480 = vmatpush1.msra.mxu1 %v420_v63 }
 0x169   :  { %481 = vmatprep.subr.mxu1 %v419_v2  ;;  %v576_v2 = vpop.permute.xlu0 %575 }
 0x16a   :  { %482 = vmatpush1.msra.mxu1 %v418_v4 }
 0x16b   :  { %483 = vmatprep.subr.mxu1 %v417_v6 }
 0x16c   :  { %484 = vmatpush1.msra.mxu1 %v416_v8 }
 0x16d   :  { %485 = vmatprep.subr.mxu1 %v415_v11  ;;  %v667_v11 = vpop.permute.xlu0 %666 }
 0x16e   :  { %486 = vmatpush1.msra.mxu1 %v414_v13 }
 0x16f   :  { %487 = vmatprep.subr.mxu1 %v413_v16  ;;  %v743_v16 = vld [vmem:[%s1401_s10] sm:$0x1] }
 0x170   :  { %488 = vmatpush1.msra.mxu1 %v412_v18  ;;  %v751_v18 = vshrl.u32 %v750_v17, 7 }
 0x171   :  { %489 = vmatprep.subr.mxu1 %v411_v20  ;;  %v748_v20 = vpop.permute.xlu1 %747 }
 0x172   :  { %490 = vmatpush1.msra.mxu1 %v410_v22  ;;  %v752_v19 = vsub.s32 0, %v751_v18 }
 0x173   :  { %491 = vmatprep.subr.mxu1 %v409_v23 }
 0x174   :  { %492 = vmatpush1.msra.mxu1 %v408_v24  ;;  %v753_v21 = vrot.slane %v748_v20, %v752_v19 }
 0x175   :  { %493 = vmatprep.subr.mxu1 %v407_v25 }
 0x176   :  { %494 = vmatpush1.msra.mxu1 %v406_v26 }
 0x177   :  { %883 = vmatmul.mubr.msk.f32.vlgmr.msra.gmra.mxu1 %vm450_vm1, %v422_v27 }
 0x178   :  { %533 = vmatprep.mubr.f32.mxu1 %v954_v34 }
 0x17b   :  { %884 = vmatmul.mubr.msk.f32.gmra.mxu1 %vm450_vm1, %v423_v28 }
 0x17c   :  { %539 = vmatprep.mubr.f32.mxu1 %v954_v34 }
 0x17f   :  { %885 = vmatmul.mubr.msk.f32.gmra.mxu1 %vm450_vm1, %v424_v29 }
 0x180   :  { %545 = vmatprep.mubr.f32.mxu1 %v954_v34 }
 0x183   :  { %886 = vmatmul.mubr.msk.f32.gmra.mxu1 %vm450_vm1, %v425_v30 }
 0x184   :  { %910 = vmatprep.mubr.msk.f32.mxu1 %vm578_vm2, %v564_v31 }
 0x237   :  { %v529_v32 = vpop.f32.mrf.mxu1 }
 0x238   :  { %v530_v55 = vadd.f32 %v529_v32, %v433_v46 }
 0x239   :  { %v531_v33 = vpop.f32.mrf.mxu1 }
 0x23a   :  { %v532_v50 = vadd.f32 %v531_v33, %v433_v46  ;;  %v552_v62 = vmax.f32 %v530_v55, 0.0 }
 0x23b   :  { %v535_v35 = vpop.f32.mrf.mxu1 }
 0x23c   :  { %v536_v51 = vadd.f32 %v535_v35, %v438_v44  ;;  %v553_v59 = vmax.f32 %v532_v50, 0.0 }
 0x23d   :  { %v537_v36 = vpop.f32.mrf.mxu1 }
 0x23e   :  { %v538_v47 = vadd.f32 %v537_v36, %v438_v44  ;;  %v554_v60 = vmax.f32 %v536_v51, 0.0  ;;  %v560_v0 = vsub.f32 %v552_v62, %v553_v59 }
 0x23f   :  { %v541_v38 = vpop.f32.mrf.mxu1 }
 0x240   :  { %v542_v48 = vadd.f32 %v541_v38, %v443_v39  ;;  %v555_v56 = vmax.f32 %v538_v47, 0.0 }
 0x241   :  { %v543_v40 = vpop.f32.mrf.mxu1 }
 0x242   :  { %v544_v42 = vadd.f32 %v543_v40, %v443_v39  ;;  %v556_v57 = vmax.f32 %v542_v48, 0.0  ;;  %v561_v63 = vsub.f32 %v554_v60, %v555_v56 }
 0x243   :  { %v547_v41 = vpop.f32.mrf.mxu1 }
 0x244   :  { %v548_v43 = vadd.f32 %v547_v41, %v448_v37  ;;  %v557_v52 = vmax.f32 %v544_v42, 0.0 }
 0x245   :  { %v549_v45 = vpop.f32.mrf.mxu1 }
 0x246   :  { %v550_v49 = vadd.f32 %v549_v45, %v448_v37  ;;  %v558_v53 = vmax.f32 %v548_v43, 0.0  ;;  %v562_v61 = vsub.f32 %v556_v57, %v557_v52 }
 0x248   :  { %v559_v54 = vmax.f32 %v550_v49, 0.0 }
 0x24a   :  { %v563_v58 = vsub.f32 %v558_v53, %v559_v54 }
 0x24c   :  { %902 = vmatprep.subr.mxu1 %v563_v58 }
 0x24d   :  { %903 = vmatpush3.msra.mxu1 %v563_v58 }
 0x24e   :  { %904 = vmatprep.subr.mxu1 %v562_v61 }
 0x24f   :  { %905 = vmatpush3.msra.mxu1 %v562_v61 }
 0x250   :  { %906 = vmatprep.subr.mxu1 %v561_v63 }
 0x251   :  { %907 = vmatpush3.msra.mxu1 %v561_v63 }
 0x252   :  { %908 = vmatprep.subr.mxu1 %v560_v0 }
 0x253   :  { %909 = vmatpush3.msra.mxu1 %v560_v0 }
 0x254   :  { %911 = vmatmul.mubr.msk.f32.vlgmr.msra.gmra.mxu1 %vm578_vm2, %v565_v1  ;;  %913 = vmatprep.subr.mxu1 %v954_v34 }
 0x255   :  { %917 = vmatprep.mubr.msk.f32.mxu1 %vm955_vm3, %v954_v34 }
 0x314   :  { %v912_v3 = vpop.f32.mrf.mxu1 }
 0x315   :  { %v657_v4 = vadd.f32 %v912_v3, %v576_v2 }
 0x316   :  { %v651_v6 = vpop.f32.mrf.mxu1 }
 0x317   :  { %v661_v7 = vmax.f32 %v657_v4, 0.0  ;;  %v652_v8 = vadd.f32 %v651_v6, %v571_v5 }
 0x319   :  { %v660_v9 = vmax.f32 %v652_v8, 0.0  ;;  %914 = vmatpush3.msra.mxu1 %v661_v7 }
 0x31a   :  { %915 = vmatprep.subr.mxu1 %v954_v34 }
 0x31b   :  { %916 = vmatpush3.msra.mxu1 %v660_v9 }
 0x31c   :  { %918 = vmatmul.mubr.msk.f32.vlgmr.msra.gmra.mxu1 %vm172_vm0, %v662_v10  ;;  %920 = vmatprep.subr.mxu1 %v954_v34 }
 0x31d   :  { %922 = vmatprep.mubr.msk.f32.mxu1 %vm955_vm3, %v954_v34 }
 0x3dc   :  { %v738_v12 = vpop.f32.mrf.mxu1 }
 0x3dd   :  { %v739_v13 = vadd.f32 %v738_v12, %v667_v11 }
 0x3de   :  { %v919_v14 = vpop.f32.mrf.mxu1 }
 0x3df   :  { %v742_v15 = vmax.f32 %v739_v13, 0.0 }
 0x3e1   :  { %921 = vmatpush3.msra.mxu1 %v742_v15 }
 0x3e2   :  { %923 = vmatmul.mubr.msk.f32.vlgmr.msra.gmra.mxu1 %vm754_vm4, %v743_v16 }
 0x4a2   :  { %v824_v34 = vpop.f32.mrf.mxu1 }
 0x4a3   :  { %v825_v22 = vadd.f32 %v824_v34, %v753_v21 }
 0x4a4   :  { %v924_v23 = vpop.f32.mrf.mxu1 }
 0x4a5   :  { %828 = vst [vmem:[#allocation3] sm:$0x1] %v825_v22 }
 0x4a6   :  { %942 = shalt.err (!%p939_p4)
}
 0x4a7   :  { %838 = dma.vmem_to_hbm [thread:$0]  %s836_s27, 16, %s1403_s12, [#allocation4]  }
 0x4a8   :  { %951 = dma.done.wait [#allocation4], 16  }
 0x4a9   :  { %952 = vsyncadd [#allocation4], 4294967280 }
 0x4aa   :  { %842 = vsyncpa [#allocation4], 1 }

</bundles_post_ra>
